<compile_context>
chip_gen: v7x
topology: tpu7x:2x2x1
jax: 0.10.0
libtpu: 0.0.40
codegen_flags: <defaults>
</compile_context>

<pallas_src>
import jax
import jax.numpy as jnp
from jax.experimental import pallas as pl
from jax.experimental.pallas import tpu as pltpu


def _round_up(v, m):
    return (v + m - 1) // m * m


def _sublane_multiple(dtype):
    # Native sublane packing: 4-byte -> 8, 2-byte -> 16, 1-byte -> 32.
    return {4: 8, 2: 16, 1: 32}.get(jnp.dtype(dtype).itemsize, 8)


def _vmem_capacity_bytes():
    try:
        cap = getattr(pltpu.get_tpu_info(), "vmem_capacity_bytes", None)
        if cap:
            return int(cap)
    except Exception:
        pass
    return 64 << 20  # conservative fallback = v7x per-TensorCore VMEM


def mlp_kernel(x_ref, w1_ref, b1_ref, w2_ref, b2_ref, o_ref):
    # fc1: (tm, K) @ (K, H) on the MXU with f32 accumulation.
    h = jnp.dot(x_ref[...], w1_ref[...], preferred_element_type=jnp.float32)
    # Bias + ReLU in f32 on the VPU.
    h = jnp.maximum(h + b1_ref[...], 0.0)
    # fc2: (tm, H) @ (H, Op) with f32 accumulation.  Casting the activations
    # to the weight dtype is a deliberate precision choice for the bf16 path
    # (the MXU itself does not require it).
    y = jnp.dot(h.astype(w2_ref.dtype), w2_ref[...],
                preferred_element_type=jnp.float32)
    o_ref[...] = (y + b2_ref[...]).astype(o_ref.dtype)


def mlp_forward(x, w1, b1, w2, b2, *, tm=256, compute_dtype=None):
    """x: (B, in); w1: (in, hidden); b1: (hidden,) or (1, hidden);
       w2: (hidden, out); b2: (out,) or (1, out)  ->  (B, out)."""
    B, K = x.shape
    Kw, H = w1.shape
    Hw, O = w2.shape
    assert Kw == K and Hw == H
    out_dtype = x.dtype
    cd = jnp.dtype(compute_dtype) if compute_dtype is not None else jnp.dtype(x.dtype)

    # Row tile: dtype-aware sublane rounding; collapse to one full-height tile
    # for small batches (grid=(1,), no pad rows).  tm=256 fills the 256x256
    # MXU on v6e/v7x; v5e callers may pass tm=128 (its MXU is 4x128x128).
    sub = _sublane_multiple(cd)
    if B <= tm:
        tm_eff = _round_up(max(B, 1), sub)
    else:
        tm_eff = _round_up(tm, sub)
    grid = (pl.cdiv(B, tm_eff),)

    # Only the OUTPUT lane dim is padded to 128 (unmasked vst).  That requires
    # padding w2/b2 along their (small) output-column dim; x, w1 and b1 are
    # passed un-padded with full-extent ragged block dims.
    Op = _round_up(O, 128)

    xc = x.astype(cd)
    w1c = w1.astype(cd)
    b1c = jnp.asarray(b1, jnp.float32).reshape(1, H)
    if Op != O:
        w2c = jnp.zeros((H, Op), cd).at[:, :O].set(w2.astype(cd))
        b2c = jnp.zeros((1, Op), jnp.float32).at[:, :O].set(
            jnp.asarray(b2, jnp.float32).reshape(1, O))
    else:
        w2c = w2.astype(cd)
        b2c = jnp.asarray(b2, jnp.float32).reshape(1, O)

    # Advisory cost estimate for XLA's scheduler.
    flops = 2 * B * K * H + 2 * B * H * Op
    out_item = jnp.dtype(out_dtype).itemsize
    bytes_accessed = int(xc.nbytes + w1c.nbytes + b1c.nbytes + w2c.nbytes +
                         b2c.nbytes + B * Op * out_item)

    w_item = cd.itemsize
    vmem_cap = int(_vmem_capacity_bytes() * 0.8)  # 20% headroom for compiler scratch

    def run(single_buffer_weights):
        weight_kw = ({"pipeline_mode": pl.Buffered(1)}
                     if single_buffer_weights else {})
        wbufs = 1 if single_buffer_weights else 2

        # Resident weights/biases + double-buffered x/out tiles + f32 intermediates.
        vmem_need = (wbufs * ((K * H + H * Op) * w_item + (H + Op) * 4)
                     + 2 * tm_eff * K * w_item
                     + 2 * tm_eff * Op * out_item
                     + tm_eff * (H + Op) * 4)
        if vmem_need > vmem_cap:
            # TODO(synk): tile hidden/out with a VMEM f32 accumulator once the
            # resident weights no longer fit (notably v7x's 64 MiB/TC).
            raise ValueError(
                f"MLP weights (+tiles) need ~{vmem_need >> 20} MiB VMEM but only "
                f"~{vmem_cap >> 20} MiB is available; tile the hidden/out dims.")

        cp_kwargs = dict(dimension_semantics=("parallel",))
        want = vmem_need * 3 // 2
        if want > (16 << 20):  # above the most conservative default scoped limit
            cp_kwargs["vmem_limit_bytes"] = int(min(want, vmem_cap))

        return pl.pallas_call(
            mlp_kernel,
            out_shape=jax.ShapeDtypeStruct((B, Op), out_dtype),
            grid_spec=pltpu.PrefetchScalarGridSpec(
                num_scalar_prefetch=0,
                grid=grid,
                in_specs=[
                    pl.BlockSpec((tm_eff, K), lambda i: (i, 0)),           # x rows
                    pl.BlockSpec((K, H), lambda i: (0, 0), **weight_kw),   # w1
                    pl.BlockSpec((1, H), lambda i: (0, 0), **weight_kw),   # b1
                    pl.BlockSpec((H, Op), lambda i: (0, 0), **weight_kw),  # w2
                    pl.BlockSpec((1, Op), lambda i: (0, 0), **weight_kw),  # b2
                ],
                out_specs=pl.BlockSpec((tm_eff, Op), lambda i: (i, 0)),
            ),
            compiler_params=pltpu.CompilerParams(**cp_kwargs),
            cost_estimate=pl.CostEstimate(
                flops=flops, transcendentals=0, bytes_accessed=bytes_accessed),
        )(xc, w1c, b1c, w2c, b2c)

    try:
        out = run(single_buffer_weights=True)
    except (TypeError, AttributeError, NotImplementedError, pltpu.LoweringException):
        # Only the "pipeline_mode / Buffered(1) unsupported" case falls back to
        # default double-buffered weights; VMEM OOM and other errors propagate.
        out = run(single_buffer_weights=False)

    return out if Op == O else out[:, :O]


if __name__ == "__main__":
    key = jax.random.PRNGKey(0)
    k_x, k_w1, k_b1, k_w2, k_b2, k_x2 = jax.random.split(key, 6)

    # Small but non-trivial shapes: ragged batch and feature dims that are not
    # multiples of 8/128, to exercise full-extent ragged blocks + output pad.
    batch = 200
    input_size = 48
    hidden_size = 96
    output_size = 24

    x = jax.random.normal(k_x, (batch, input_size), dtype=jnp.float32)

    # PyTorch-style Linear init (weights stored transposed as (in, out)).
    scale1 = 1.0 / jnp.sqrt(input_size)
    scale2 = 1.0 / jnp.sqrt(hidden_size)
    w1 = jax.random.uniform(k_w1, (input_size, hidden_size),
                            minval=-scale1, maxval=scale1, dtype=jnp.float32)
    b1 = jax.random.uniform(k_b1, (1, hidden_size),
                            minval=-scale1, maxval=scale1, dtype=jnp.float32)
    w2 = jax.random.uniform(k_w2, (hidden_size, output_size),
                            minval=-scale2, maxval=scale2, dtype=jnp.float32)
    b2 = jax.random.uniform(k_b2, (1, output_size),
                            minval=-scale2, maxval=scale2, dtype=jnp.float32)

    ref = jnp.maximum(x @ w1 + b1, 0.0) @ w2 + b2

    # f32 path, small batch (single full-height tile, grid=(1,)).
    out = jax.block_until_ready(mlp_forward(x, w1, b1, w2, b2))
    assert out.shape == (batch, output_size)
    assert jnp.allclose(out, ref, atol=1e-5, rtol=1e-5), "f32 mismatch vs reference"

    # bf16-operand path (f32 MXU accumulation), looser tolerance.
    out_bf16 = jax.block_until_ready(
        mlp_forward(x, w1, b1, w2, b2, compute_dtype=jnp.bfloat16))
    assert out_bf16.shape == (batch, output_size)
    assert jnp.allclose(out_bf16, ref, atol=5e-2, rtol=5e-2), "bf16 mismatch vs reference"

    # Multi-step grid with a partial last row tile (exercises cdiv masking).
    batch2 = 600
    x2 = jax.random.normal(k_x2, (batch2, input_size), dtype=jnp.float32)
    ref2 = jnp.maximum(x2 @ w1 + b1, 0.0) @ w2 + b2
    out2 = jax.block_until_ready(mlp_forward(x2, w1, b1, w2, b2, tm=256))
    assert out2.shape == (batch2, output_size)
    assert jnp.allclose(out2, ref2, atol=1e-5, rtol=1e-5), "multi-tile mismatch vs reference"

    print("KERNEL_OK")
</pallas_src>

<mosaic_0001>
module attributes {stable_mosaic.version = 11 : i64} {
  func.func @mlp_kernel(%arg0: i32, %arg1: memref<200x48xf32, #tpu.memory_space<vmem>>, %arg2: memref<48x96xf32, #tpu.memory_space<vmem>>, %arg3: memref<1x96xf32, #tpu.memory_space<vmem>>, %arg4: memref<96x128xf32, #tpu.memory_space<vmem>>, %arg5: memref<1x128xf32, #tpu.memory_space<vmem>>, %arg6: memref<200x128xf32, #tpu.memory_space<vmem>>) attributes {dimension_semantics = [#tpu.dimension_semantics<parallel>], iteration_bounds = array<i64: 1>, scalar_prefetch = 0 : i64, scratch_operands = 0 : i64, tpu.core_type = #tpu.core_type<tc>, window_params = [{transform_indices = @transform_0, window_bounds = array<i64: 200, 48>}, {pipeline_mode = #tpu.pipeline_mode<synchronous>, transform_indices = @transform_1, window_bounds = array<i64: 48, 96>}, {pipeline_mode = #tpu.pipeline_mode<synchronous>, transform_indices = @transform_2, window_bounds = array<i64: 1, 96>}, {pipeline_mode = #tpu.pipeline_mode<synchronous>, transform_indices = @transform_3, window_bounds = array<i64: 96, 128>}, {pipeline_mode = #tpu.pipeline_mode<synchronous>, transform_indices = @transform_4, window_bounds = array<i64: 1, 128>}, {transform_indices = @transform_5, window_bounds = array<i64: 200, 128>}]} {
    %c0 = arith.constant 0 : index
    %c0_0 = arith.constant 0 : index
    %0 = vector.load %arg1[%c0, %c0_0] : memref<200x48xf32, #tpu.memory_space<vmem>>, vector<200x48xf32>
    %c0_1 = arith.constant 0 : index
    %c0_2 = arith.constant 0 : index
    %1 = vector.load %arg2[%c0_1, %c0_2] : memref<48x96xf32, #tpu.memory_space<vmem>>, vector<48x96xf32>
    %cst = arith.constant dense<0.000000e+00> : vector<200x96xf32>
    %2 = tpu.matmul %0, %1, %cst {dimension_numbers = #tpu.dot_dimension_numbers<[1], [0], [0], [1], [0, 0, 1, 1], [], []>} : vector<200x48xf32>, vector<48x96xf32>, vector<200x96xf32> -> vector<200x96xf32>
    %c0_3 = arith.constant 0 : index
    %c0_4 = arith.constant 0 : index
    %3 = vector.load %arg3[%c0_3, %c0_4] : memref<1x96xf32, #tpu.memory_space<vmem>>, vector<1x96xf32>
    %4 = vector.broadcast %3 : vector<1x96xf32> to vector<200x96xf32>
    %5 = arith.addf %2, %4 : vector<200x96xf32>
    %cst_5 = arith.constant 0.000000e+00 : f32
    %6 = vector.broadcast %cst_5 : f32 to vector<200x96xf32>
    %7 = arith.maximumf %5, %6 : vector<200x96xf32>
    %c0_6 = arith.constant 0 : index
    %c0_7 = arith.constant 0 : index
    %8 = vector.load %arg4[%c0_6, %c0_7] : memref<96x128xf32, #tpu.memory_space<vmem>>, vector<96x128xf32>
    %cst_8 = arith.constant dense<0.000000e+00> : vector<200x128xf32>
    %9 = tpu.matmul %7, %8, %cst_8 {dimension_numbers = #tpu.dot_dimension_numbers<[1], [0], [0], [1], [0, 0, 1, 1], [], []>} : vector<200x96xf32>, vector<96x128xf32>, vector<200x128xf32> -> vector<200x128xf32>
    %c0_9 = arith.constant 0 : index
    %c0_10 = arith.constant 0 : index
    %10 = vector.load %arg5[%c0_9, %c0_10] : memref<1x128xf32, #tpu.memory_space<vmem>>, vector<1x128xf32>
    %11 = vector.broadcast %10 : vector<1x128xf32> to vector<200x128xf32>
    %12 = arith.addf %9, %11 : vector<200x128xf32>
    %c0_11 = arith.constant 0 : index
    %c0_12 = arith.constant 0 : index
    %13 = vector.load %arg6[%c0_11, %c0_12] : memref<200x128xf32, #tpu.memory_space<vmem>>, vector<200x128xf32>
    tpu.vector_store %arg6[%c0_11, %c0_12], %12 {strides = array<i32>} : memref<200x128xf32, #tpu.memory_space<vmem>>, vector<200x128xf32>,
    return
  }
  func.func @transform_0(%arg0: i32) -> (i32, i32) {
    %c0_i32 = arith.constant 0 : i32
    %c0_i32_0 = arith.constant 0 : i32
    return %arg0, %c0_i32 : i32, i32
  }
  func.func @transform_1(%arg0: i32) -> (i32, i32) {
    %c0_i32 = arith.constant 0 : i32
    %c0_i32_0 = arith.constant 0 : i32
    %c0_i32_1 = arith.constant 0 : i32
    return %c0_i32, %c0_i32_0 : i32, i32
  }
  func.func @transform_2(%arg0: i32) -> (i32, i32) {
    %c0_i32 = arith.constant 0 : i32
    %c0_i32_0 = arith.constant 0 : i32
    %c0_i32_1 = arith.constant 0 : i32
    return %c0_i32, %c0_i32_0 : i32, i32
  }
  func.func @transform_3(%arg0: i32) -> (i32, i32) {
    %c0_i32 = arith.constant 0 : i32
    %c0_i32_0 = arith.constant 0 : i32
    %c0_i32_1 = arith.constant 0 : i32
    return %c0_i32, %c0_i32_0 : i32, i32
  }
  func.func @transform_4(%arg0: i32) -> (i32, i32) {
    %c0_i32 = arith.constant 0 : i32
    %c0_i32_0 = arith.constant 0 : i32
    %c0_i32_1 = arith.constant 0 : i32
    return %c0_i32, %c0_i32_0 : i32, i32
  }
  func.func @transform_5(%arg0: i32) -> (i32, i32) {
    %c0_i32 = arith.constant 0 : i32
    %c0_i32_0 = arith.constant 0 : i32
    return %arg0, %c0_i32 : i32, i32
  }
}

</mosaic_0001>

<bundles_post_ra>
// kernel: tpu_custom_call.1
= control target key start
LH: loop header
LB: loop body
LE: loop exit
PB: predicated region body
PF: predicated region fallthrough
CT: control target
= control target key end

     0   :  { %v1051_v3 = vmov 0.0|0.0   ;;  %vm1052_vm0 = vmmov 0   ;;  %v1053_v6 = vmov 0.0   ;;  %vm59_vm1 = vcmask 392192   ;;  %s1453_s0 = inlined_call_operand.vmem [shape: f32[200,48], index: 0, kind: input, shape index: {}]   ;;  %s1454_s1 = inlined_call_operand.vmem [shape: f32[48,96], index: 1, kind: input, shape index: {}]   ;;  %s1455_s2 = inlined_call_operand.vmem [shape: f32[1,96], index: 2, kind: input, shape index: {}]   ;;  %s1456_s3 = inlined_call_operand.vmem [shape: f32[96,128], index: 3, kind: input, shape index: {}]   ;;  %s1457_s4 = inlined_call_operand.vmem [shape: f32[1,128], index: 4, kind: input, shape index: {}]   ;;  %s1458_s5 = inlined_call_operand.hbm [shape: f32[200,128], index: 5, kind: output, shape index: {}]  }
   0x1   :  { %v46_v0 = vld [vmem:[%s1454_s1] sm:$0xff]  ;;  %v47_v1 = vld [vmem:[%s1454_s1 + $0x8] sm:$0xff]  ;;  %v48_v2 = vld [vmem:[%s1454_s1 + $0x10] sm:$0xff]  ;;  %982 = vmatprep.subr.bf16.mxu0 %v1051_v3  ;;  %808 = vmatprep.mubr.msk.f32.mxu0 %vm1052_vm0, %v1053_v6 }
   0x2   :  { %v983_v4 = vpack.c.bf16 %v47_v1, %v46_v0  ;;  %v49_v5 = vld [vmem:[%s1454_s1 + $0x18] sm:$0xff]  ;;  %1009 = vmatprep.subr.bf16.mxu1 %v1051_v3  ;;  %910 = vmatprep.mubr.msk.f32.mxu1 %vm1052_vm0, %v1053_v6  ;;  %v50_v8 = vld [vmem:[%s1454_s1 + $0x20] sm:$0xff]  ;;  %v51_v9 = vld [vmem:[%s1454_s1 + $0x28] sm:$0xff] }
   0x3   :  { %v986_v7 = vpack.c.bf16 %v49_v5, %v48_v2  ;;  %v989_v10 = vpack.c.bf16 %v51_v9, %v50_v8  ;;  %v350_v11 = vld [vmem:[%s1456_s3] sm:$0xff]  ;;  %v351_v12 = vld [vmem:[%s1456_s3 + $0x8] sm:$0xff]  ;;  %v352_v15 = vld [vmem:[%s1456_s3 + $0x10] sm:$0xff] }
   0x4   :  { %984 = vmatpush3.bf16.msra.mxu0 %v983_v4  ;;  %v21_v13 = vld [vmem:[%s1453_s0] sm:$0xff]  ;;  %v992_v14 = vpack.c.bf16 %v351_v12, %v350_v11  ;;  %v353_v16 = vld [vmem:[%s1456_s3 + $0x18] sm:$0xff] }
   0x5   :  { %985 = vmatprep.subr.bf16.mxu0 %v1051_v3 }
   0x6   :  { %1015 = vmatpush3.bf16.msra.mxu1 %v992_v14 }
   0x7   :  { %1010 = vmatprep.subr.bf16.mxu1 %v1051_v3 }
   0x8   :  { %987 = vmatpush3.bf16.msra.mxu0 %v986_v7 }
   0x9   :  { %988 = vmatprep.subr.bf16.mxu0 %v1051_v3 }
   0xc   :  { %990 = vmatpush3.bf16.msra.mxu0 %v989_v10 }
   0xd   :  { %991 = vmatprep.subr.bf16.mxu0 %v1051_v3 }
   0xf   :  { %809 = vmatmul.mubr.msk.f32.vlgmr.msra.gmra.mrb[0].mxu0 %vm59_vm1, %v21_v13 }
  0x10   :  { %10 = vsyncpa [#allocation3], 0  ;;  %811 = vmatprep.mubr.msk.f32.mxu0 %vm1052_vm0, %v1053_v6  ;;  %v22_v17 = vld [vmem:[%s1453_s0 + $0x8] sm:$0xff]  ;;  %993 = vmatpush3.bf16.msra.mxu0 %v992_v14  ;;  %v995_v18 = vpack.c.bf16 %v353_v16, %v352_v15  ;;  %v354_v19 = vld [vmem:[%s1456_s3 + $0x20] sm:$0xff]  ;;  %vm369_vm2 = vcmask 785408  }
  0x11   :  { %994 = vmatprep.subr.bf16.mxu0 %v1051_v3  ;;  %v355_v20 = vld [vmem:[%s1456_s3 + $0x28] sm:$0xff]  ;;  %v23_v21 = vld [vmem:[%s1453_s0 + $0x10] sm:$0xff]  ;;  %v357_v24 = vld [vmem:[%s1456_s3 + $0x38] sm:$0xff] }
  0x12   :  { %1016 = vmatpush3.bf16.msra.mxu1 %v995_v18  ;;  %v998_v22 = vpack.c.bf16 %v355_v20, %v354_v19  ;;  %v356_v23 = vld [vmem:[%s1456_s3 + $0x30] sm:$0xff]  ;;  %v24_v25 = vld [vmem:[%s1453_s0 + $0x18] sm:$0xff]  ;;  %v358_v27 = vld [vmem:[%s1456_s3 + $0x40] sm:$0xff] }
  0x13   :  { %812 = vmatmul.mubr.msk.f32.gmra.mrb[2].mxu0 %vm59_vm1, %v22_v17  ;;  %1011 = vmatprep.subr.bf16.mxu1 %v1051_v3  ;;  %v1001_v26 = vpack.c.bf16 %v357_v24, %v356_v23  ;;  %v359_v28 = vld [vmem:[%s1456_s3 + $0x48] sm:$0xff]  ;;  %v25_v29 = vld [vmem:[%s1453_s0 + $0x20] sm:$0xff]  ;;  %v27_v32 = vld [vmem:[%s1453_s0 + $0x30] sm:$0xff] }
  0x14   :  { %814 = vmatprep.mubr.msk.f32.mxu0 %vm1052_vm0, %v1053_v6  ;;  %996 = vmatpush3.bf16.msra.mxu0 %v995_v18  ;;  %v1004_v30 = vpack.c.bf16 %v359_v28, %v358_v27  ;;  %v26_v31 = vld [vmem:[%s1453_s0 + $0x28] sm:$0xff]  ;;  %v28_v33 = vld [vmem:[%s1453_s0 + $0x38] sm:$0xff]  ;;  %v29_v34 = vld [vmem:[%s1453_s0 + $0x40] sm:$0xff] }
  0x15   :  { %997 = vmatprep.subr.bf16.mxu0 %v1051_v3  ;;  %v30_v35 = vld [vmem:[%s1453_s0 + $0x48] sm:$0xff]  ;;  %v31_v36 = vld [vmem:[%s1453_s0 + $0x50] sm:$0xff]  ;;  %v32_v37 = vld [vmem:[%s1453_s0 + $0x58] sm:$0xff] }
  0x16   :  { %1017 = vmatpush3.bf16.msra.mxu1 %v998_v22  ;;  %v33_v38 = vld [vmem:[%s1453_s0 + $0x60] sm:$0xff]  ;;  %v34_v39 = vld [vmem:[%s1453_s0 + $0x68] sm:$0xff]  ;;  %v35_v40 = vld [vmem:[%s1453_s0 + $0x70] sm:$0xff] }
  0x17   :  { %815 = vmatmul.mubr.msk.f32.gmra.mrb[4].mxu0 %vm59_vm1, %v23_v21  ;;  %1012 = vmatprep.subr.bf16.mxu1 %v1051_v3  ;;  %v36_v41 = vld [vmem:[%s1453_s0 + $0x78] sm:$0xff]  ;;  %v37_v42 = vld [vmem:[%s1453_s0 + $0x80] sm:$0xff]  ;;  %v38_v43 = vld [vmem:[%s1453_s0 + $0x88] sm:$0xff] }
  0x18   :  { %817 = vmatprep.mubr.msk.f32.mxu0 %vm1052_vm0, %v1053_v6  ;;  %999 = vmatpush3.bf16.msra.mxu0 %v998_v22  ;;  %v39_v44 = vld [vmem:[%s1453_s0 + $0x90] sm:$0xff]  ;;  %v40_v45 = vld [vmem:[%s1453_s0 + $0x98] sm:$0xff]  ;;  %v41_v46 = vld [vmem:[%s1453_s0 + $0xa0] sm:$0xff] }
  0x19   :  { %1000 = vmatprep.subr.bf16.mxu0 %v1051_v3  ;;  %v42_v47 = vld [vmem:[%s1453_s0 + $0xa8] sm:$0xff]  ;;  %v360_v48 = vld [vmem:[%s1456_s3 + $0x50] sm:$0xff]  ;;  %v361_v49 = vld [vmem:[%s1456_s3 + $0x58] sm:$0xff] }
  0x1a   :  { %1018 = vmatpush3.bf16.msra.mxu1 %v1001_v26  ;;  %v1007_v50 = vpack.c.bf16 %v361_v49, %v360_v48  ;;  %v43_v51 = vld [vmem:[%s1453_s0 + $0xb0] sm:$0xff]  ;;  %v44_v52 = vld [vmem:[%s1453_s0 + $0xb8] sm:$0xff]  ;;  %v45_v53 = vld [vmem:[%s1453_s0 + $0xc0] sm:$0xff] }
  0x1b   :  { %818 = vmatmul.mubr.msk.f32.gmra.mrb[6].mxu0 %vm59_vm1, %v24_v25  ;;  %1013 = vmatprep.subr.bf16.mxu1 %v1051_v3  ;;  %v1313_v54 = vld [vmem:[%s1455_s2] ss:$0 sm:$0xff] }
  0x1c   :  { %820 = vmatprep.mubr.msk.f32.mxu0 %vm1052_vm0, %v1053_v6  ;;  %1002 = vmatpush3.bf16.msra.mxu0 %v1001_v26 }
  0x1d   :  { %1003 = vmatprep.subr.bf16.mxu0 %v1051_v3 }
  0x1e   :  { %1019 = vmatpush3.bf16.msra.mxu1 %v1004_v30 }
  0x1f   :  { %821 = vmatmul.mubr.msk.f32.gmra.mrb[8].mxu0 %vm59_vm1, %v25_v29  ;;  %1014 = vmatprep.subr.bf16.mxu1 %v1051_v3 }
  0x20   :  { %823 = vmatprep.mubr.msk.f32.mxu0 %vm1052_vm0, %v1053_v6  ;;  %1005 = vmatpush3.bf16.msra.mxu0 %v1004_v30 }
  0x21   :  { %1006 = vmatprep.subr.bf16.mxu0 %v1051_v3 }
  0x22   :  { %1020 = vmatpush3.bf16.msra.mxu1 %v1007_v50 }
  0x23   :  { %824 = vmatmul.mubr.msk.f32.gmra.mrb[10].mxu0 %vm59_vm1, %v26_v31 }
  0x24   :  { %826 = vmatprep.mubr.msk.f32.mxu0 %vm1052_vm0, %v1053_v6  ;;  %1008 = vmatpush3.bf16.msra.mxu0 %v1007_v50 }
  0x27   :  { %827 = vmatmul.mubr.msk.f32.gmra.mrb[12].mxu0 %vm59_vm1, %v27_v32 }
  0x28   :  { %829 = vmatprep.mubr.msk.f32.mxu0 %vm1052_vm0, %v1053_v6 }
  0x2b   :  { %830 = vmatmul.mubr.msk.f32.gmra.mrb[14].mxu0 %vm59_vm1, %v28_v33 }
  0x2c   :  { %832 = vmatprep.mubr.msk.f32.mxu0 %vm1052_vm0, %v1053_v6 }
  0x2f   :  { %833 = vmatmul.mubr.msk.f32.gmra.mrb[16].mxu0 %vm59_vm1, %v29_v34 }
  0x30   :  { %835 = vmatprep.mubr.msk.f32.mxu0 %vm1052_vm0, %v1053_v6 }
  0x33   :  { %836 = vmatmul.mubr.msk.f32.gmra.mrb[18].mxu0 %vm59_vm1, %v30_v35 }
  0x34   :  { %838 = vmatprep.mubr.msk.f32.mxu0 %vm1052_vm0, %v1053_v6 }
  0x37   :  { %839 = vmatmul.mubr.msk.f32.gmra.mrb[20].mxu0 %vm59_vm1, %v31_v36 }
  0x38   :  { %841 = vmatprep.mubr.msk.f32.mxu0 %vm1052_vm0, %v1053_v6 }
  0x3b   :  { %842 = vmatmul.mubr.msk.f32.gmra.mrb[22].mxu0 %vm59_vm1, %v32_v37 }
  0x3c   :  { %844 = vmatprep.mubr.msk.f32.mxu0 %vm1052_vm0, %v1053_v6 }
  0x3f   :  { %845 = vmatmul.mubr.msk.f32.gmra.mrb[24].mxu0 %vm59_vm1, %v33_v38 }
  0x40   :  { %847 = vmatprep.mubr.msk.f32.mxu0 %vm1052_vm0, %v1053_v6 }
  0x43   :  { %848 = vmatmul.mubr.msk.f32.gmra.mrb[26].mxu0 %vm59_vm1, %v34_v39 }
  0x44   :  { %850 = vmatprep.mubr.msk.f32.mxu0 %vm1052_vm0, %v1053_v6 }
  0x47   :  { %851 = vmatmul.mubr.msk.f32.gmra.mrb[28].mxu0 %vm59_vm1, %v35_v40 }
  0x48   :  { %853 = vmatprep.mubr.msk.f32.mxu0 %vm1052_vm0, %v1053_v6 }
  0x4b   :  { %854 = vmatmul.mubr.msk.f32.gmra.mrb[30].mxu0 %vm59_vm1, %v36_v41 }
  0x4c   :  { %856 = vmatprep.mubr.msk.f32.mxu0 %vm1052_vm0, %v1053_v6 }
  0x4f   :  { %857 = vmatmul.mubr.msk.f32.gmra.mrb[32].mxu0 %vm59_vm1, %v37_v42 }
  0x50   :  { %859 = vmatprep.mubr.msk.f32.mxu0 %vm1052_vm0, %v1053_v6 }
  0x53   :  { %860 = vmatmul.mubr.msk.f32.gmra.mrb[34].mxu0 %vm59_vm1, %v38_v43 }
  0x54   :  { %862 = vmatprep.mubr.msk.f32.mxu0 %vm1052_vm0, %v1053_v6 }
  0x57   :  { %863 = vmatmul.mubr.msk.f32.gmra.mrb[36].mxu0 %vm59_vm1, %v39_v44 }
  0x58   :  { %865 = vmatprep.mubr.msk.f32.mxu0 %vm1052_vm0, %v1053_v6 }
  0x5b   :  { %866 = vmatmul.mubr.msk.f32.gmra.mrb[38].mxu0 %vm59_vm1, %v40_v45 }
  0x5c   :  { %868 = vmatprep.mubr.msk.f32.mxu0 %vm1052_vm0, %v1053_v6 }
  0x5f   :  { %869 = vmatmul.mubr.msk.f32.gmra.mrb[40].mxu0 %vm59_vm1, %v41_v46 }
  0x60   :  { %871 = vmatprep.mubr.msk.f32.mxu0 %vm1052_vm0, %v1053_v6 }
  0x63   :  { %872 = vmatmul.mubr.msk.f32.gmra.mrb[42].mxu0 %vm59_vm1, %v42_v47 }
  0x64   :  { %874 = vmatprep.mubr.msk.f32.mxu0 %vm1052_vm0, %v1053_v6 }
  0x67   :  { %875 = vmatmul.mubr.msk.f32.gmra.mrb[44].mxu0 %vm59_vm1, %v43_v51 }
  0x68   :  { %877 = vmatprep.mubr.msk.f32.mxu0 %vm1052_vm0, %v1053_v6 }
  0x6b   :  { %878 = vmatmul.mubr.msk.f32.gmra.mrb[46].mxu0 %vm59_vm1, %v44_v52 }
  0x6c   :  { %880 = vmatprep.mubr.msk.f32.mxu0 %vm1052_vm0, %v1053_v6 }
  0x6f   :  { %881 = vmatmul.mubr.msk.f32.gmra.mrb[48].mxu0 %vm59_vm1, %v45_v53 }
  0x70   :  { %907 = vmatprep.mubr.msk.f32.mxu0 %vm1052_vm0, %v1053_v6 }
  0xe2   :  { %v201_v55 = vpop.f32.mrb[0].mxu0 }
  0xe3   :  { %v202_v56 = vadd.f32 %v1313_v54, %v201_v55  ;;  %v810_v57 = vpop.f32.mrb[1].mxu0 }
  0xe5   :  { %v325_v58 = vmax.f32 %v202_v56, 0.0 }
  0xe6   :  { %v206_v59 = vpop.f32.mrb[2].mxu0 }
  0xe7   :  { %v207_v60 = vadd.f32 %v1313_v54, %v206_v59  ;;  %v813_v61 = vpop.f32.mrb[3].mxu0  ;;  %908 = vmatmul.mubr.msk.f32.vlgmr.msra.gmra.mrb[50].mxu0 %vm369_vm2, %v325_v58 }
  0xe9   :  { %v326_v62 = vmax.f32 %v207_v60, 0.0 }
  0xea   :  { %v211_v63 = vpop.f32.mrb[4].mxu0 }
  0xeb   :  { %v212_v0 = vadd.f32 %v1313_v54, %v211_v63  ;;  %v816_v1 = vpop.f32.mrb[5].mxu0  ;;  %911 = vmatmul.mubr.msk.f32.vlgmr.msra.gmra.mrb[0].mxu1 %vm369_vm2, %v326_v62 }
  0xec   :  { %913 = vmatprep.mubr.msk.f32.mxu1 %vm1052_vm0, %v1053_v6 }
  0xed   :  { %v327_v2 = vmax.f32 %v212_v0, 0.0 }
  0xee   :  { %v216_v3 = vpop.f32.mrb[6].mxu0 }
  0xef   :  { %v217_v4 = vadd.f32 %v1313_v54, %v216_v3  ;;  %v819_v5 = vpop.f32.mrb[7].mxu0  ;;  %914 = vmatmul.mubr.msk.f32.gmra.mrb[2].mxu1 %vm369_vm2, %v327_v2 }
  0xf0   :  { %916 = vmatprep.mubr.msk.f32.mxu1 %vm1052_vm0, %v1053_v6 }
  0xf1   :  { %v328_v7 = vmax.f32 %v217_v4, 0.0 }
  0xf2   :  { %v221_v8 = vpop.f32.mrb[8].mxu0 }
  0xf3   :  { %v222_v9 = vadd.f32 %v1313_v54, %v221_v8  ;;  %v822_v10 = vpop.f32.mrb[9].mxu0  ;;  %917 = vmatmul.mubr.msk.f32.gmra.mrb[4].mxu1 %vm369_vm2, %v328_v7 }
  0xf4   :  { %919 = vmatprep.mubr.msk.f32.mxu1 %vm1052_vm0, %v1053_v6 }
  0xf5   :  { %v329_v11 = vmax.f32 %v222_v9, 0.0 }
  0xf6   :  { %v226_v12 = vpop.f32.mrb[10].mxu0 }
  0xf7   :  { %v227_v13 = vadd.f32 %v1313_v54, %v226_v12  ;;  %v825_v14 = vpop.f32.mrb[11].mxu0  ;;  %920 = vmatmul.mubr.msk.f32.gmra.mrb[6].mxu1 %vm369_vm2, %v329_v11 }
  0xf8   :  { %922 = vmatprep.mubr.msk.f32.mxu1 %vm1052_vm0, %v1053_v6 }
  0xf9   :  { %v330_v15 = vmax.f32 %v227_v13, 0.0 }
  0xfa   :  { %v231_v16 = vpop.f32.mrb[12].mxu0 }
  0xfb   :  { %v232_v17 = vadd.f32 %v1313_v54, %v231_v16  ;;  %v828_v18 = vpop.f32.mrb[13].mxu0  ;;  %923 = vmatmul.mubr.msk.f32.gmra.mrb[8].mxu1 %vm369_vm2, %v330_v15 }
  0xfc   :  { %925 = vmatprep.mubr.msk.f32.mxu1 %vm1052_vm0, %v1053_v6 }
  0xfd   :  { %v331_v19 = vmax.f32 %v232_v17, 0.0 }
  0xfe   :  { %v236_v20 = vpop.f32.mrb[14].mxu0 }
  0xff   :  { %v237_v21 = vadd.f32 %v1313_v54, %v236_v20  ;;  %v831_v22 = vpop.f32.mrb[15].mxu0  ;;  %926 = vmatmul.mubr.msk.f32.gmra.mrb[10].mxu1 %vm369_vm2, %v331_v19 }
 0x100   :  { %928 = vmatprep.mubr.msk.f32.mxu1 %vm1052_vm0, %v1053_v6 }
 0x101   :  { %v332_v23 = vmax.f32 %v237_v21, 0.0 }
 0x102   :  { %v241_v24 = vpop.f32.mrb[16].mxu0 }
 0x103   :  { %v242_v25 = vadd.f32 %v1313_v54, %v241_v24  ;;  %v834_v26 = vpop.f32.mrb[17].mxu0  ;;  %929 = vmatmul.mubr.msk.f32.gmra.mrb[12].mxu1 %vm369_vm2, %v332_v23 }
 0x104   :  { %931 = vmatprep.mubr.msk.f32.mxu1 %vm1052_vm0, %v1053_v6 }
 0x105   :  { %v333_v27 = vmax.f32 %v242_v25, 0.0 }
 0x106   :  { %v246_v28 = vpop.f32.mrb[18].mxu0 }
 0x107   :  { %v247_v29 = vadd.f32 %v1313_v54, %v246_v28  ;;  %v837_v30 = vpop.f32.mrb[19].mxu0  ;;  %932 = vmatmul.mubr.msk.f32.gmra.mrb[14].mxu1 %vm369_vm2, %v333_v27 }
 0x108   :  { %934 = vmatprep.mubr.msk.f32.mxu1 %vm1052_vm0, %v1053_v6  ;;  %v1414_v30 = vld [vmem:[%s1457_s4] ss:$0 sm:$0xff]  ;;  %s1054_s4 = smov [#allocation2]  }
 0x109   :  { %v334_v31 = vmax.f32 %v247_v29, 0.0  ;;  %s665_s27 = sshll.u32 %s1054_s4, 4  ;;  %s666_s27 = int_to_ptr.vmem [resolvable:$true] %s665_s27 }
 0x10a   :  { %v251_v32 = vpop.f32.mrb[20].mxu0  ;;  %s1027_s28 = scalar_lea.vmem %s666_s27, 3200  ;;  %p1032_p1 = scmp.lt.s32.totalorder %s666_s27, %s666_s27 }
 0x10b   :  { %v252_v33 = vadd.f32 %v1313_v54, %v251_v32  ;;  %v840_v34 = vpop.f32.mrb[21].mxu0  ;;  %935 = vmatmul.mubr.msk.f32.gmra.mrb[16].mxu1 %vm369_vm2, %v334_v31  ;;  %p1028_p0 = scmp.ne.s32.totalorder %s666_s27, %s1027_s28  ;;  %p1033_p2 = scmp.lt.s32.totalorder %s1027_s28, %s1027_s28 }
 0x10c   :  { %937 = vmatprep.mubr.msk.f32.mxu1 %vm1052_vm0, %v1053_v6 }
 0x10d   :  { %v335_v35 = vmax.f32 %v252_v33, 0.0  ;;  %p1034_p3 = por %p1033_p2, %p1032_p1 }
 0x10e   :  { %v256_v36 = vpop.f32.mrb[22].mxu0 }
 0x10f   :  { %v257_v37 = vadd.f32 %v1313_v54, %v256_v36  ;;  %v843_v38 = vpop.f32.mrb[23].mxu0  ;;  %938 = vmatmul.mubr.msk.f32.gmra.mrb[18].mxu1 %vm369_vm2, %v335_v35  ;;  %p1035_p4 = pnand %p1034_p3, %p1028_p0 }
 0x110   :  { %940 = vmatprep.mubr.msk.f32.mxu1 %vm1052_vm0, %v1053_v6 }
 0x111   :  { %v336_v39 = vmax.f32 %v257_v37, 0.0 }
 0x112   :  { %v261_v40 = vpop.f32.mrb[24].mxu0 }
 0x113   :  { %v262_v41 = vadd.f32 %v1313_v54, %v261_v40  ;;  %v846_v42 = vpop.f32.mrb[25].mxu0  ;;  %941 = vmatmul.mubr.msk.f32.gmra.mrb[20].mxu1 %vm369_vm2, %v336_v39 }
 0x114   :  { %943 = vmatprep.mubr.msk.f32.mxu1 %vm1052_vm0, %v1053_v6 }
 0x115   :  { %v337_v43 = vmax.f32 %v262_v41, 0.0 }
 0x116   :  { %v266_v44 = vpop.f32.mrb[26].mxu0 }
 0x117   :  { %v267_v45 = vadd.f32 %v1313_v54, %v266_v44  ;;  %v849_v46 = vpop.f32.mrb[27].mxu0  ;;  %944 = vmatmul.mubr.msk.f32.gmra.mrb[22].mxu1 %vm369_vm2, %v337_v43 }
 0x118   :  { %946 = vmatprep.mubr.msk.f32.mxu1 %vm1052_vm0, %v1053_v6 }
 0x119   :  { %v338_v47 = vmax.f32 %v267_v45, 0.0 }
 0x11a   :  { %v271_v48 = vpop.f32.mrb[28].mxu0 }
 0x11b   :  { %v272_v49 = vadd.f32 %v1313_v54, %v271_v48  ;;  %v852_v50 = vpop.f32.mrb[29].mxu0  ;;  %947 = vmatmul.mubr.msk.f32.gmra.mrb[24].mxu1 %vm369_vm2, %v338_v47 }
 0x11c   :  { %949 = vmatprep.mubr.msk.f32.mxu1 %vm1052_vm0, %v1053_v6 }
 0x11d   :  { %v339_v51 = vmax.f32 %v272_v49, 0.0 }
 0x11e   :  { %v276_v52 = vpop.f32.mrb[30].mxu0 }
 0x11f   :  { %v277_v53 = vadd.f32 %v1313_v54, %v276_v52  ;;  %v855_v55 = vpop.f32.mrb[31].mxu0  ;;  %950 = vmatmul.mubr.msk.f32.gmra.mrb[26].mxu1 %vm369_vm2, %v339_v51 }
 0x120   :  { %952 = vmatprep.mubr.msk.f32.mxu1 %vm1052_vm0, %v1053_v6 }
 0x121   :  { %v340_v56 = vmax.f32 %v277_v53, 0.0 }
 0x122   :  { %v281_v57 = vpop.f32.mrb[32].mxu0 }
 0x123   :  { %v282_v58 = vadd.f32 %v1313_v54, %v281_v57  ;;  %v858_v59 = vpop.f32.mrb[33].mxu0  ;;  %953 = vmatmul.mubr.msk.f32.gmra.mrb[28].mxu1 %vm369_vm2, %v340_v56 }
 0x124   :  { %955 = vmatprep.mubr.msk.f32.mxu1 %vm1052_vm0, %v1053_v6 }
 0x125   :  { %v341_v60 = vmax.f32 %v282_v58, 0.0 }
 0x126   :  { %v286_v61 = vpop.f32.mrb[34].mxu0 }
 0x127   :  { %v287_v62 = vadd.f32 %v1313_v54, %v286_v61  ;;  %v861_v63 = vpop.f32.mrb[35].mxu0  ;;  %956 = vmatmul.mubr.msk.f32.gmra.mrb[30].mxu1 %vm369_vm2, %v341_v60 }
 0x128   :  { %958 = vmatprep.mubr.msk.f32.mxu1 %vm1052_vm0, %v1053_v6 }
 0x129   :  { %v342_v0 = vmax.f32 %v287_v62, 0.0 }
 0x12a   :  { %v291_v1 = vpop.f32.mrb[36].mxu0 }
 0x12b   :  { %v292_v2 = vadd.f32 %v1313_v54, %v291_v1  ;;  %v864_v3 = vpop.f32.mrb[37].mxu0  ;;  %959 = vmatmul.mubr.msk.f32.gmra.mrb[32].mxu1 %vm369_vm2, %v342_v0 }
 0x12c   :  { %961 = vmatprep.mubr.msk.f32.mxu1 %vm1052_vm0, %v1053_v6 }
 0x12d   :  { %v343_v4 = vmax.f32 %v292_v2, 0.0 }
 0x12e   :  { %v296_v5 = vpop.f32.mrb[38].mxu0 }
 0x12f   :  { %v297_v7 = vadd.f32 %v1313_v54, %v296_v5  ;;  %v867_v8 = vpop.f32.mrb[39].mxu0  ;;  %962 = vmatmul.mubr.msk.f32.gmra.mrb[34].mxu1 %vm369_vm2, %v343_v4 }
 0x130   :  { %964 = vmatprep.mubr.msk.f32.mxu1 %vm1052_vm0, %v1053_v6 }
 0x131   :  { %v344_v9 = vmax.f32 %v297_v7, 0.0 }
 0x132   :  { %v301_v10 = vpop.f32.mrb[40].mxu0 }
 0x133   :  { %v302_v11 = vadd.f32 %v1313_v54, %v301_v10  ;;  %v870_v12 = vpop.f32.mrb[41].mxu0  ;;  %965 = vmatmul.mubr.msk.f32.gmra.mrb[36].mxu1 %vm369_vm2, %v344_v9 }
 0x134   :  { %967 = vmatprep.mubr.msk.f32.mxu1 %vm1052_vm0, %v1053_v6 }
 0x135   :  { %v345_v13 = vmax.f32 %v302_v11, 0.0 }
 0x136   :  { %v306_v14 = vpop.f32.mrb[42].mxu0 }
 0x137   :  { %v307_v15 = vadd.f32 %v1313_v54, %v306_v14  ;;  %v873_v16 = vpop.f32.mrb[43].mxu0  ;;  %968 = vmatmul.mubr.msk.f32.gmra.mrb[38].mxu1 %vm369_vm2, %v345_v13 }
 0x138   :  { %970 = vmatprep.mubr.msk.f32.mxu1 %vm1052_vm0, %v1053_v6 }
 0x139   :  { %v346_v17 = vmax.f32 %v307_v15, 0.0 }
 0x13a   :  { %v311_v18 = vpop.f32.mrb[44].mxu0 }
 0x13b   :  { %v312_v19 = vadd.f32 %v1313_v54, %v311_v18  ;;  %v876_v20 = vpop.f32.mrb[45].mxu0  ;;  %971 = vmatmul.mubr.msk.f32.gmra.mrb[40].mxu1 %vm369_vm2, %v346_v17 }
 0x13c   :  { %973 = vmatprep.mubr.msk.f32.mxu1 %vm1052_vm0, %v1053_v6 }
 0x13d   :  { %v347_v21 = vmax.f32 %v312_v19, 0.0 }
 0x13e   :  { %v316_v22 = vpop.f32.mrb[46].mxu0 }
 0x13f   :  { %v317_v23 = vadd.f32 %v1313_v54, %v316_v22  ;;  %v879_v24 = vpop.f32.mrb[47].mxu0  ;;  %974 = vmatmul.mubr.msk.f32.gmra.mrb[42].mxu1 %vm369_vm2, %v347_v21 }
 0x140   :  { %976 = vmatprep.mubr.msk.f32.mxu1 %vm1052_vm0, %v1053_v6 }
 0x141   :  { %v348_v25 = vmax.f32 %v317_v23, 0.0 }
 0x142   :  { %v321_v26 = vpop.f32.mrb[48].mxu0 }
 0x143   :  { %v322_v27 = vadd.f32 %v1313_v54, %v321_v26  ;;  %v882_v28 = vpop.f32.mrb[49].mxu0  ;;  %977 = vmatmul.mubr.msk.f32.gmra.mrb[44].mxu1 %vm369_vm2, %v348_v25 }
 0x144   :  { %979 = vmatprep.mubr.msk.f32.mxu1 %vm1052_vm0, %v1053_v6 }
 0x145   :  { %v349_v29 = vmax.f32 %v322_v27, 0.0 }
 0x147   :  { %980 = vmatmul.mubr.msk.f32.gmra.mrb[46].mxu1 %vm369_vm2, %v349_v29 }
 0x1ba   :  { %v511_v31 = vpop.f32.mrb[50].mxu0 }
 0x1bb   :  { %v512_v32 = vadd.f32 %v1414_v30, %v511_v31  ;;  %v909_v33 = vpop.f32.mrb[51].mxu0 }
 0x1bd   :  { %635 = vst [vmem:[#allocation2] sm:$0xff] %v512_v32 }
 0x1be   :  { %v516_v54 = vpop.f32.mrb[0].mxu1 }
 0x1bf   :  { %v517_v34 = vadd.f32 %v1414_v30, %v516_v54  ;;  %v912_v35 = vpop.f32.mrb[1].mxu1 }
 0x1c1   :  { %636 = vst [vmem:[#allocation2 + $0x8] sm:$0xff] %v517_v34 }
 0x1c2   :  { %v521_v36 = vpop.f32.mrb[2].mxu1 }
 0x1c3   :  { %v522_v6 = vadd.f32 %v1414_v30, %v521_v36  ;;  %v915_v37 = vpop.f32.mrb[3].mxu1 }
 0x1c5   :  { %637 = vst [vmem:[#allocation2 + $0x10] sm:$0xff] %v522_v6 }
 0x1c6   :  { %v526_v38 = vpop.f32.mrb[4].mxu1 }
 0x1c7   :  { %v527_v39 = vadd.f32 %v1414_v30, %v526_v38  ;;  %v918_v40 = vpop.f32.mrb[5].mxu1 }
 0x1c9   :  { %638 = vst [vmem:[#allocation2 + $0x18] sm:$0xff] %v527_v39 }
 0x1ca   :  { %v531_v41 = vpop.f32.mrb[6].mxu1 }
 0x1cb   :  { %v532_v42 = vadd.f32 %v1414_v30, %v531_v41  ;;  %v921_v43 = vpop.f32.mrb[7].mxu1 }
 0x1cd   :  { %639 = vst [vmem:[#allocation2 + $0x20] sm:$0xff] %v532_v42 }
 0x1ce   :  { %v536_v44 = vpop.f32.mrb[8].mxu1 }
 0x1cf   :  { %v537_v45 = vadd.f32 %v1414_v30, %v536_v44  ;;  %v924_v46 = vpop.f32.mrb[9].mxu1 }
 0x1d1   :  { %640 = vst [vmem:[#allocation2 + $0x28] sm:$0xff] %v537_v45 }
 0x1d2   :  { %v541_v47 = vpop.f32.mrb[10].mxu1 }
 0x1d3   :  { %v542_v48 = vadd.f32 %v1414_v30, %v541_v47  ;;  %v927_v49 = vpop.f32.mrb[11].mxu1 }
 0x1d5   :  { %641 = vst [vmem:[#allocation2 + $0x30] sm:$0xff] %v542_v48 }
 0x1d6   :  { %v546_v50 = vpop.f32.mrb[12].mxu1 }
 0x1d7   :  { %v547_v51 = vadd.f32 %v1414_v30, %v546_v50  ;;  %v930_v52 = vpop.f32.mrb[13].mxu1 }
 0x1d9   :  { %642 = vst [vmem:[#allocation2 + $0x38] sm:$0xff] %v547_v51 }
 0x1da   :  { %v551_v53 = vpop.f32.mrb[14].mxu1 }
 0x1db   :  { %v552_v55 = vadd.f32 %v1414_v30, %v551_v53  ;;  %v933_v56 = vpop.f32.mrb[15].mxu1 }
 0x1dd   :  { %643 = vst [vmem:[#allocation2 + $0x40] sm:$0xff] %v552_v55 }
 0x1de   :  { %v556_v57 = vpop.f32.mrb[16].mxu1 }
 0x1df   :  { %v557_v58 = vadd.f32 %v1414_v30, %v556_v57  ;;  %v936_v59 = vpop.f32.mrb[17].mxu1 }
 0x1e1   :  { %644 = vst [vmem:[#allocation2 + $0x48] sm:$0xff] %v557_v58 }
 0x1e2   :  { %v561_v60 = vpop.f32.mrb[18].mxu1 }
 0x1e3   :  { %v562_v61 = vadd.f32 %v1414_v30, %v561_v60  ;;  %v939_v62 = vpop.f32.mrb[19].mxu1 }
 0x1e5   :  { %645 = vst [vmem:[#allocation2 + $0x50] sm:$0xff] %v562_v61 }
 0x1e6   :  { %v566_v63 = vpop.f32.mrb[20].mxu1 }
 0x1e7   :  { %v567_v0 = vadd.f32 %v1414_v30, %v566_v63  ;;  %v942_v1 = vpop.f32.mrb[21].mxu1 }
 0x1e9   :  { %646 = vst [vmem:[#allocation2 + $0x58] sm:$0xff] %v567_v0 }
 0x1ea   :  { %v571_v2 = vpop.f32.mrb[22].mxu1 }
 0x1eb   :  { %v572_v3 = vadd.f32 %v1414_v30, %v571_v2  ;;  %v945_v4 = vpop.f32.mrb[23].mxu1 }
 0x1ed   :  { %647 = vst [vmem:[#allocation2 + $0x60] sm:$0xff] %v572_v3 }
 0x1ee   :  { %v576_v5 = vpop.f32.mrb[24].mxu1 }
 0x1ef   :  { %v577_v7 = vadd.f32 %v1414_v30, %v576_v5  ;;  %v948_v8 = vpop.f32.mrb[25].mxu1 }
 0x1f1   :  { %648 = vst [vmem:[#allocation2 + $0x68] sm:$0xff] %v577_v7 }
 0x1f2   :  { %v581_v9 = vpop.f32.mrb[26].mxu1 }
 0x1f3   :  { %v582_v10 = vadd.f32 %v1414_v30, %v581_v9  ;;  %v951_v11 = vpop.f32.mrb[27].mxu1 }
 0x1f5   :  { %649 = vst [vmem:[#allocation2 + $0x70] sm:$0xff] %v582_v10 }
 0x1f6   :  { %v586_v12 = vpop.f32.mrb[28].mxu1 }
 0x1f7   :  { %v587_v13 = vadd.f32 %v1414_v30, %v586_v12  ;;  %v954_v14 = vpop.f32.mrb[29].mxu1 }
 0x1f9   :  { %650 = vst [vmem:[#allocation2 + $0x78] sm:$0xff] %v587_v13 }
 0x1fa   :  { %v591_v15 = vpop.f32.mrb[30].mxu1 }
 0x1fb   :  { %v592_v16 = vadd.f32 %v1414_v30, %v591_v15  ;;  %v957_v17 = vpop.f32.mrb[31].mxu1 }
 0x1fd   :  { %651 = vst [vmem:[#allocation2 + $0x80] sm:$0xff] %v592_v16 }
 0x1fe   :  { %v596_v18 = vpop.f32.mrb[32].mxu1 }
 0x1ff   :  { %v597_v19 = vadd.f32 %v1414_v30, %v596_v18  ;;  %v960_v20 = vpop.f32.mrb[33].mxu1 }
 0x201   :  { %652 = vst [vmem:[#allocation2 + $0x88] sm:$0xff] %v597_v19 }
 0x202   :  { %v601_v21 = vpop.f32.mrb[34].mxu1 }
 0x203   :  { %v602_v22 = vadd.f32 %v1414_v30, %v601_v21  ;;  %v963_v23 = vpop.f32.mrb[35].mxu1 }
 0x205   :  { %653 = vst [vmem:[#allocation2 + $0x90] sm:$0xff] %v602_v22 }
 0x206   :  { %v606_v24 = vpop.f32.mrb[36].mxu1 }
 0x207   :  { %v607_v25 = vadd.f32 %v1414_v30, %v606_v24  ;;  %v966_v26 = vpop.f32.mrb[37].mxu1 }
 0x209   :  { %654 = vst [vmem:[#allocation2 + $0x98] sm:$0xff] %v607_v25 }
 0x20a   :  { %v611_v27 = vpop.f32.mrb[38].mxu1 }
 0x20b   :  { %v612_v28 = vadd.f32 %v1414_v30, %v611_v27  ;;  %v969_v29 = vpop.f32.mrb[39].mxu1 }
 0x20d   :  { %655 = vst [vmem:[#allocation2 + $0xa0] sm:$0xff] %v612_v28 }
 0x20e   :  { %v616_v31 = vpop.f32.mrb[40].mxu1 }
 0x20f   :  { %v617_v32 = vadd.f32 %v1414_v30, %v616_v31  ;;  %v972_v33 = vpop.f32.mrb[41].mxu1 }
 0x211   :  { %656 = vst [vmem:[#allocation2 + $0xa8] sm:$0xff] %v617_v32 }
 0x212   :  { %v621_v54 = vpop.f32.mrb[42].mxu1 }
 0x213   :  { %v622_v34 = vadd.f32 %v1414_v30, %v621_v54  ;;  %v975_v35 = vpop.f32.mrb[43].mxu1 }
 0x215   :  { %657 = vst [vmem:[#allocation2 + $0xb0] sm:$0xff] %v622_v34 }
 0x216   :  { %v626_v36 = vpop.f32.mrb[44].mxu1 }
 0x217   :  { %v627_v6 = vadd.f32 %v1414_v30, %v626_v36  ;;  %v978_v37 = vpop.f32.mrb[45].mxu1 }
 0x219   :  { %658 = vst [vmem:[#allocation2 + $0xb8] sm:$0xff] %v627_v6 }
 0x21a   :  { %v631_v38 = vpop.f32.mrb[46].mxu1 }
 0x21b   :  { %v632_v39 = vadd.f32 %v1414_v30, %v631_v38  ;;  %v981_v40 = vpop.f32.mrb[47].mxu1 }
 0x21d   :  { %659 = vst [vmem:[#allocation2 + $0xc0] sm:$0xff] %v632_v39 }
 0x21e   :  { %1038 = shalt.err (!%p1035_p4)
}
 0x21f   :  { %s1039_s6 = scalar_lea.hbm %s1458_s5, 3200 }
 0x220   :  { %p1040_p5 = scmp.ne.s32.totalorder %s1458_s5, %s1039_s6  ;;  %p1043_p6 = scmp.lt.u32.totalorder %s1039_s6, %s1458_s5 }
 0x222   :  { %p1045_p7 = pnand %p1043_p6, %p1040_p5 }
 0x224   :  { %1048 = shalt.err (!%p1045_p7)
}
 0x225   :  { %s1055_s1 = smov 128   ;;  %s1056_s11 = smov 8  }
 0x226   :  { %671 = dma.vmem_to_hbm [thread:$0]  %s666_s27, 3200, %s1458_s5, [#allocation3], %s1055_s1, %s1055_s1, %s1056_s11  }
 0x227   :  { %1049 = dma.done.wait [#allocation3], 3200  }
 0x228   :  { %1050 = vsyncadd [#allocation3], 4294964096 }
 0x229   :  { %675 = vsyncpa [#allocation3], 1 }

</bundles_post_ra>
